<compile_context>
chip_gen: v7x
topology: tpu7x:2x2x1
jax: 0.10.0
libtpu: 0.0.40
codegen_flags: <defaults>
</compile_context>

<pallas_src>
import jax
import jax.numpy as jnp
from jax.experimental import pallas as pl
from jax.experimental.pallas import tpu as pltpu

_MAX_TILE_B = 2048  # lane-axis batch tile cap (well under VMEM limits)


def _actor_critic_fused_kernel(x_ref, w1_ref, w2_ref, w3_ref, b_ref, out_ref):
    x = x_ref[...]            # [3, TB]   float32, batch on lanes
    b = b_ref[...]            # [2H, 3]   col0 = b1, col1 = b2, col2[:2] = b3

    # Fused layer 1: [2H, 3] @ [3, TB] -> [2H, TB]  (actor rows | critic rows)
    h = jnp.tanh(
        jnp.dot(w1_ref[...], x, preferred_element_type=jnp.float32) + b[:, 0:1])
    # Fused layer 2: block-diagonal [2H, 2H] keeps actor/critic independent.
    h = jnp.tanh(
        jnp.dot(w2_ref[...], h, preferred_element_type=jnp.float32) + b[:, 1:2])
    # Fused heads: [2, 2H] @ [2H, TB] -> [2, TB]; row 0 = mean, row 1 = value.
    out_ref[...] = (
        jnp.dot(w3_ref[...], h, preferred_element_type=jnp.float32) + b[0:2, 2:3])


def pack_params(raw):
    """Pack 12 per-layer tensors (+ log_std) into 4 transposed fused slabs."""
    H = raw["aw1"].shape[1]

    # Layer 1 (transposed): [2H, 3]
    w1_t = jnp.concatenate([raw["aw1"].T, raw["cw1"].T], axis=0)

    # Layer 2 (transposed, block-diagonal): [2H, 2H] -- exact, no cross-talk.
    # TODO(synk): if 2H ever exceeds 128, split layer 2 into two [H, H] matmuls
    # on v5e (128x128 MXU); with H=32 the block-diag padding is free everywhere.
    w2_t = jnp.zeros((2 * H, 2 * H), jnp.float32)
    w2_t = w2_t.at[:H, :H].set(raw["aw2"].T).at[H:, H:].set(raw["cw2"].T)

    # Heads (transposed): [2, 2H]; row 0 = actor head, row 1 = critic head.
    w3_t = jnp.zeros((2, 2 * H), jnp.float32)
    w3_t = w3_t.at[0, :H].set(raw["aw3"][:, 0]).at[1, H:].set(raw["cw3"][:, 0])

    # Biases packed column-wise as [2H, 3] (broadcast over lanes in-kernel).
    bias = jnp.zeros((2 * H, 3), jnp.float32)
    bias = bias.at[:, 0].set(jnp.concatenate([raw["ab1"][0], raw["cb1"][0]]))
    bias = bias.at[:, 1].set(jnp.concatenate([raw["ab2"][0], raw["cb2"][0]]))
    bias = bias.at[0, 2].set(raw["ab3"][0, 0]).at[1, 2].set(raw["cb3"][0, 0])

    return {"w1t": w1_t, "w2t": w2_t, "w3t": w3_t, "bias": bias,
            "policy_log_std": raw["policy_log_std"]}


def _round_up(x, m):
    return ((x + m - 1) // m) * m


@jax.jit
def actor_critic_forward(state, packed):
    """Returns (policy_mean [B,1], policy_std [1,1], value [B])."""
    B = state.shape[0]
    H2 = packed["w1t"].shape[0]  # 2 * hidden_size

    # Batch tiling on the lane axis:
    #  * small B  -> one full-array block (block == full dims satisfies the
    #    (8,128) rule even when B is not a multiple of 128);
    #  * large B  -> 128-aligned tiles with >= 2 grid steps so both v7x
    #    TensorCores get work (harmless on single-TC v5e/v6e), capped at
    #    _MAX_TILE_B to stay far under VMEM while amortizing per-step overhead.
    if B <= 384:
        TB = Bp = B
    else:
        TB = min(_MAX_TILE_B, _round_up(pl.cdiv(B, 2), 128))
        Bp = _round_up(B, TB)

    state_t = state.T                                     # [3, B] features-major
    if Bp != B:
        state_t = jnp.pad(state_t, ((0, 0), (0, Bp - B)))  # padded cols sliced off

    weight_spec = lambda shape: pl.BlockSpec(shape, lambda i: (0, 0))

    flops = 2 * B * (3 * H2 + H2 * H2 + H2 * 2)
    bytes_accessed = 4 * (3 * Bp + 2 * Bp + H2 * 3 + H2 * H2 + 2 * H2 + H2 * 3)

    out2 = pl.pallas_call(
        _actor_critic_fused_kernel,
        out_shape=jax.ShapeDtypeStruct((2, Bp), jnp.float32),
        grid_spec=pltpu.PrefetchScalarGridSpec(
            num_scalar_prefetch=0,
            grid=(Bp // TB,),
            in_specs=[
                pl.BlockSpec((3, TB), lambda i: (0, i)),   # state tile (lane-dense)
                weight_spec((H2, 3)),                      # fused layer-1 weight^T
                weight_spec((H2, H2)),                     # fused layer-2 weight^T
                weight_spec((2, H2)),                      # fused heads^T
                weight_spec((H2, 3)),                      # packed biases
            ],
            out_specs=pl.BlockSpec((2, TB), lambda i: (0, i)),
        ),
        compiler_params=pltpu.CompilerParams(
            dimension_semantics=("parallel",)),            # v7x: batch over 2 TCs
        cost_estimate=pl.CostEstimate(
            flops=flops,
            transcendentals=2 * B * H2,
            bytes_accessed=bytes_accessed),
    )(state_t, packed["w1t"], packed["w2t"], packed["w3t"], packed["bias"])

    mean = out2[0, :B][:, None]                            # [B, 1]
    value = out2[1, :B]                                    # [B]
    # TODO(synk): torch.distributions.Normal has no Pallas equivalent; we return
    # (mean, std) which fully parameterize it.
    policy_std = jnp.exp(packed["policy_log_std"])         # [1, 1]
    return mean, policy_std, value


def init_raw_params(hidden_size, key):
    """PyTorch-Linear-style init (uniform +-1/sqrt(fan_in)); weights stored
    as [in_features, out_features]."""
    def linear(key, fan_in, fan_out):
        kw, kb = jax.random.split(key)
        bound = 1.0 / jnp.sqrt(fan_in)
        w = jax.random.uniform(kw, (fan_in, fan_out), jnp.float32, -bound, bound)
        b = jax.random.uniform(kb, (1, fan_out), jnp.float32, -bound, bound)
        return w, b

    keys = jax.random.split(key, 6)
    aw1, ab1 = linear(keys[0], 3, hidden_size)
    aw2, ab2 = linear(keys[1], hidden_size, hidden_size)
    aw3, ab3 = linear(keys[2], hidden_size, 1)
    cw1, cb1 = linear(keys[3], 3, hidden_size)
    cw2, cb2 = linear(keys[4], hidden_size, hidden_size)
    cw3, cb3 = linear(keys[5], hidden_size, 1)
    return {
        "aw1": aw1, "ab1": ab1, "aw2": aw2, "ab2": ab2, "aw3": aw3, "ab3": ab3,
        "cw1": cw1, "cb1": cb1, "cw2": cw2, "cb2": cb2, "cw3": cw3, "cb3": cb3,
        "policy_log_std": jnp.zeros((1, 1), jnp.float32),
    }


def _reference_forward(state, p):
    """Pure-JAX reference (unfused, batch-major) for validation."""
    h = jnp.tanh(state @ p["aw1"] + p["ab1"])
    h = jnp.tanh(h @ p["aw2"] + p["ab2"])
    mean = h @ p["aw3"] + p["ab3"]
    g = jnp.tanh(state @ p["cw1"] + p["cb1"])
    g = jnp.tanh(g @ p["cw2"] + p["cb2"])
    val = (g @ p["cw3"] + p["cb3"])[:, 0]
    return mean, jnp.exp(p["policy_log_std"]), val


if __name__ == "__main__":
    B = 8            # batch
    HIDDEN = 32      # hidden_size

    key = jax.random.PRNGKey(0)
    k_state, k_params = jax.random.split(key)
    state = jax.random.normal(k_state, (B, 3), jnp.float32)

    raw = init_raw_params(HIDDEN, k_params)
    packed = pack_params(raw)

    mean, std, value = actor_critic_forward(state, packed)
    jax.block_until_ready((mean, std, value))

    ref_mean, ref_std, ref_value = _reference_forward(state, raw)
    assert mean.shape == (B, 1) and value.shape == (B,) and std.shape == (1, 1)
    assert jnp.allclose(mean, ref_mean, atol=1e-4)
    assert jnp.allclose(value, ref_value, atol=1e-4)
    assert jnp.allclose(std, ref_std, atol=1e-6)

    print("KERNEL_OK")
</pallas_src>

<mosaic_0001>
module attributes {stable_mosaic.version = 11 : i64} {
  func.func @_actor_critic_fused_kernel(%arg0: i32, %arg1: memref<3x8xf32, #tpu.memory_space<vmem>>, %arg2: memref<64x3xf32, #tpu.memory_space<vmem>>, %arg3: memref<64x64xf32, #tpu.memory_space<vmem>>, %arg4: memref<2x64xf32, #tpu.memory_space<vmem>>, %arg5: memref<64x3xf32, #tpu.memory_space<vmem>>, %arg6: memref<2x8xf32, #tpu.memory_space<vmem>>) attributes {dimension_semantics = [#tpu.dimension_semantics<parallel>], iteration_bounds = array<i64: 1>, scalar_prefetch = 0 : i64, scratch_operands = 0 : i64, tpu.core_type = #tpu.core_type<tc>, window_params = [{transform_indices = @transform_0, window_bounds = array<i64: 3, 8>}, {pipeline_mode = #tpu.pipeline_mode<synchronous>, transform_indices = @transform_1, window_bounds = array<i64: 64, 3>}, {pipeline_mode = #tpu.pipeline_mode<synchronous>, transform_indices = @transform_2, window_bounds = array<i64: 64, 64>}, {pipeline_mode = #tpu.pipeline_mode<synchronous>, transform_indices = @transform_3, window_bounds = array<i64: 2, 64>}, {pipeline_mode = #tpu.pipeline_mode<synchronous>, transform_indices = @transform_4, window_bounds = array<i64: 64, 3>}, {transform_indices = @transform_5, window_bounds = array<i64: 2, 8>}]} {
    %c0 = arith.constant 0 : index
    %c0_0 = arith.constant 0 : index
    %0 = vector.load %arg1[%c0, %c0_0] : memref<3x8xf32, #tpu.memory_space<vmem>>, vector<3x8xf32>
    %c0_1 = arith.constant 0 : index
    %c0_2 = arith.constant 0 : index
    %1 = vector.load %arg5[%c0_1, %c0_2] : memref<64x3xf32, #tpu.memory_space<vmem>>, vector<64x3xf32>
    %c0_3 = arith.constant 0 : index
    %c0_4 = arith.constant 0 : index
    %2 = vector.load %arg2[%c0_3, %c0_4] : memref<64x3xf32, #tpu.memory_space<vmem>>, vector<64x3xf32>
    %cst = arith.constant dense<0.000000e+00> : vector<64x8xf32>
    %3 = tpu.matmul %2, %0, %cst {dimension_numbers = #tpu.dot_dimension_numbers<[1], [0], [0], [1], [0, 0, 1, 1], [], []>} : vector<64x3xf32>, vector<3x8xf32>, vector<64x8xf32> -> vector<64x8xf32>
    %4 = vector.extract_strided_slice %1 {offsets = [0, 0], sizes = [64, 1], strides = [1, 1]} : vector<64x3xf32> to vector<64x1xf32>
    %5 = vector.broadcast %4 : vector<64x1xf32> to vector<64x8xf32>
    %6 = arith.addf %3, %5 : vector<64x8xf32>
    %7 = math.tanh %6 : vector<64x8xf32>
    %c0_5 = arith.constant 0 : index
    %c0_6 = arith.constant 0 : index
    %8 = vector.load %arg3[%c0_5, %c0_6] : memref<64x64xf32, #tpu.memory_space<vmem>>, vector<64x64xf32>
    %cst_7 = arith.constant dense<0.000000e+00> : vector<64x8xf32>
    %9 = tpu.matmul %8, %7, %cst_7 {dimension_numbers = #tpu.dot_dimension_numbers<[1], [0], [0], [1], [0, 0, 1, 1], [], []>} : vector<64x64xf32>, vector<64x8xf32>, vector<64x8xf32> -> vector<64x8xf32>
    %10 = vector.extract_strided_slice %1 {offsets = [0, 1], sizes = [64, 1], strides = [1, 1]} : vector<64x3xf32> to vector<64x1xf32>
    %11 = vector.broadcast %10 : vector<64x1xf32> to vector<64x8xf32>
    %12 = arith.addf %9, %11 : vector<64x8xf32>
    %13 = math.tanh %12 : vector<64x8xf32>
    %c0_8 = arith.constant 0 : index
    %c0_9 = arith.constant 0 : index
    %14 = vector.load %arg4[%c0_8, %c0_9] : memref<2x64xf32, #tpu.memory_space<vmem>>, vector<2x64xf32>
    %cst_10 = arith.constant dense<0.000000e+00> : vector<2x8xf32>
    %15 = tpu.matmul %14, %13, %cst_10 {dimension_numbers = #tpu.dot_dimension_numbers<[1], [0], [0], [1], [0, 0, 1, 1], [], []>} : vector<2x64xf32>, vector<64x8xf32>, vector<2x8xf32> -> vector<2x8xf32>
    %16 = vector.extract_strided_slice %1 {offsets = [0, 2], sizes = [2, 1], strides = [1, 1]} : vector<64x3xf32> to vector<2x1xf32>
    %17 = vector.broadcast %16 : vector<2x1xf32> to vector<2x8xf32>
    %18 = arith.addf %15, %17 : vector<2x8xf32>
    %c0_11 = arith.constant 0 : index
    %c0_12 = arith.constant 0 : index
    %19 = vector.load %arg6[%c0_11, %c0_12] : memref<2x8xf32, #tpu.memory_space<vmem>>, vector<2x8xf32>
    tpu.vector_store %arg6[%c0_11, %c0_12], %18 {strides = array<i32>} : memref<2x8xf32, #tpu.memory_space<vmem>>, vector<2x8xf32>,
    return
  }
  func.func @transform_0(%arg0: i32) -> (i32, i32) {
    %c0_i32 = arith.constant 0 : i32
    %c0_i32_0 = arith.constant 0 : i32
    return %c0_i32, %arg0 : i32, i32
  }
  func.func @transform_1(%arg0: i32) -> (i32, i32) {
    %c0_i32 = arith.constant 0 : i32
    %c0_i32_0 = arith.constant 0 : i32
    %c0_i32_1 = arith.constant 0 : i32
    return %c0_i32, %c0_i32_0 : i32, i32
  }
  func.func @transform_2(%arg0: i32) -> (i32, i32) {
    %c0_i32 = arith.constant 0 : i32
    %c0_i32_0 = arith.constant 0 : i32
    %c0_i32_1 = arith.constant 0 : i32
    return %c0_i32, %c0_i32_0 : i32, i32
  }
  func.func @transform_3(%arg0: i32) -> (i32, i32) {
    %c0_i32 = arith.constant 0 : i32
    %c0_i32_0 = arith.constant 0 : i32
    %c0_i32_1 = arith.constant 0 : i32
    return %c0_i32, %c0_i32_0 : i32, i32
  }
  func.func @transform_4(%arg0: i32) -> (i32, i32) {
    %c0_i32 = arith.constant 0 : i32
    %c0_i32_0 = arith.constant 0 : i32
    %c0_i32_1 = arith.constant 0 : i32
    return %c0_i32, %c0_i32_0 : i32, i32
  }
  func.func @transform_5(%arg0: i32) -> (i32, i32) {
    %c0_i32 = arith.constant 0 : i32
    %c0_i32_0 = arith.constant 0 : i32
    return %c0_i32, %arg0 : i32, i32
  }
}

</mosaic_0001>

<bundles_post_ra>
// kernel: actor_critic_forward.1
= control target key start
LH: loop header
LB: loop body
LE: loop exit
PB: predicated region body
PF: predicated region fallthrough
CT: control target
= control target key end

     0   :  { %vm102_vm0 = vcmask 1042432   ;;  %vm77_vm1 = vcmask 23552   ;;  %v666_v3 = vmov 0   ;;  %vm259_vm2 = vcmask 523264   ;;  %s805_s0 = inlined_call_operand.vmem [shape: f32[3,8], index: 0, kind: input, shape index: {}]   ;;  %s806_s1 = inlined_call_operand.vmem [shape: f32[64,3], index: 1, kind: input, shape index: {}]   ;;  %s807_s4 = inlined_call_operand.vmem [shape: f32[64,3], index: 4, kind: input, shape index: {}]   ;;  %s808_s2 = inlined_call_operand.vmem [shape: f32[64,64], index: 2, kind: input, shape index: {}]   ;;  %s809_s3 = inlined_call_operand.vmem [shape: f32[2,64], index: 3, kind: input, shape index: {}]   ;;  %s810_s5 = inlined_call_operand.vmem [shape: f32[2,8], index: 5, kind: output, shape index: {}]  }
   0x1   :  { %v20_v0 = vld [vmem:[%s805_s0] sm:$0x7]  ;;  %v30_v2 = vld [vmem:[%s806_s1 + $0x8] sm:$0xff]  ;;  %628 = vset.pattern.permute.xlu0 %v666_v3  ;;  %629 = vset.pattern.permute.xlu1 %v666_v3  ;;  %v31_v4 = vld [vmem:[%s806_s1 + $0x10] sm:$0xff]  ;;  %v667_v19 = vmov 1   ;;  %v668_v63 = vmov 0.0|0.0  }
   0x2   :  { %v29_v1 = vld [vmem:[%s806_s1] sm:$0xff]  ;;  %533 = vmatprep.subr.msk.mxu0 %vm102_vm0, %v20_v0  ;;  %v23_v6 = vld [vmem:[%s807_s4 + $0x10] sm:$0xff]  ;;  %v32_v7 = vld [vmem:[%s806_s1 + $0x18] sm:$0xff]  ;;  %vm669_vm3 = vmmov 0   ;;  %vm475_vm4 = vcmask 58368  }
   0x3   :  { %535 = vmatprep.mubr.msk.f32.mxu0 %vm77_vm1, %v29_v1  ;;  %534 = vmatpush3.msk.msra.mxu0 %vm102_vm0, %v20_v0  ;;  %v719_v5 = vld [vmem:[%s807_s4] sm:$0xff]  ;;  %v22_v9 = vld [vmem:[%s807_s4 + $0x8] sm:$0xff]  ;;  %v24_v10 = vld [vmem:[%s807_s4 + $0x18] sm:$0xff]  ;;  %v670_v0 = vmov 0.0   ;;  %v671_v1 = vmov 2  }
   0x4   :  { %536 = vmatmul.mubr.msk.f32.vlgmr.msra.gmra.mrb[0].mxu0 %vm77_vm1, %v30_v2  ;;  %39 = vperm.xlu0 %628, %v719_v5   ;;  %v33_v8 = vld [vmem:[%s806_s1 + $0x20] sm:$0xff]  ;;  %v34_v11 = vld [vmem:[%s806_s1 + $0x28] sm:$0xff]  ;;  %v35_v12 = vld [vmem:[%s806_s1 + $0x30] sm:$0xff] }
   0x5   :  { %538 = vmatprep.mubr.msk.f32.mxu0 %vm77_vm1, %v31_v4  ;;  %49 = vperm.xlu1 %629, %v23_v6   ;;  %v25_v13 = vld [vmem:[%s807_s4 + $0x20] sm:$0xff]  ;;  %v26_v14 = vld [vmem:[%s807_s4 + $0x28] sm:$0xff]  ;;  %v36_v15 = vld [vmem:[%s806_s1 + $0x38] sm:$0xff] }
   0x6   :  { %v27_v16 = vld [vmem:[%s807_s4 + $0x30] sm:$0xff]  ;;  %v28_v17 = vld [vmem:[%s807_s4 + $0x38] sm:$0xff]  ;;  %v219_v18 = vld [vmem:[%s808_s2] sm:$0xff]  ;;  %610 = vmatprep.subr.bf16.mxu0 %v668_v63 }
   0x7   :  { %563 = vmatprep.mubr.msk.f32.mxu1 %vm259_vm2, %v219_v18  ;;  %v220_v56 = vld [vmem:[%s808_s2 + $0x8] sm:$0xff]  ;;  %v221_v57 = vld [vmem:[%s808_s2 + $0x10] sm:$0xff]  ;;  %v222_v58 = vld [vmem:[%s808_s2 + $0x18] sm:$0xff] }
   0x8   :  { %539 = vmatmul.mubr.msk.f32.gmra.mrb[2].mxu0 %vm77_vm1, %v32_v7  ;;  %44 = vperm.xlu0 %628, %v22_v9   ;;  %v223_v59 = vld [vmem:[%s808_s2 + $0x20] sm:$0xff]  ;;  %v224_v60 = vld [vmem:[%s808_s2 + $0x28] sm:$0xff]  ;;  %v225_v61 = vld [vmem:[%s808_s2 + $0x30] sm:$0xff] }
   0x9   :  { %541 = vmatprep.mubr.msk.f32.mxu0 %vm77_vm1, %v33_v8  ;;  %54 = vperm.xlu1 %629, %v24_v10   ;;  %v226_v62 = vld [vmem:[%s808_s2 + $0x38] sm:$0xff] }
   0xc   :  { %542 = vmatmul.mubr.msk.f32.gmra.mrb[4].mxu0 %vm77_vm1, %v34_v11  ;;  %59 = vperm.xlu0 %628, %v25_v13  }
   0xd   :  { %544 = vmatprep.mubr.msk.f32.mxu0 %vm77_vm1, %v35_v12  ;;  %64 = vperm.xlu1 %629, %v26_v14  }
  0x10   :  { %545 = vmatmul.mubr.msk.f32.gmra.mrb[6].mxu0 %vm77_vm1, %v36_v15  ;;  %69 = vperm.xlu0 %628, %v27_v16  }
  0x11   :  { %74 = vperm.xlu1 %629, %v28_v17   ;;  %591 = vmatprep.mubr.msk.f32.mxu0 %vm669_vm3, %v670_v0 }
  0x14   :  { %630 = vset.pattern.permute.xlu0 %v667_v19 }
  0x15   :  { %631 = vset.pattern.permute.xlu1 %v667_v19  ;;  %228 = vperm.xlu0 %630, %v719_v5  }
  0x16   :  { %232 = vperm.xlu1 %631, %v22_v9  }
  0x19   :  { %240 = vperm.xlu0 %630, %v24_v10  }
  0x1a   :  { %236 = vperm.xlu1 %631, %v23_v6  }
  0x1d   :  { %248 = vperm.xlu0 %630, %v26_v14  }
  0x1e   :  { %244 = vperm.xlu1 %631, %v25_v13  }
  0x21   :  { %256 = vperm.xlu0 %630, %v28_v17  }
  0x22   :  { %252 = vperm.xlu1 %631, %v27_v16  }
  0x25   :  { %633 = vset.pattern.permute.xlu0 %v671_v1 }
  0x26   :  { %632 = vset.pattern.permute.xlu1 %v671_v1 }
  0x27   :  { %399 = vperm.xlu1 %632, %v719_v5  }
  0x83   :  { %v40_v20 = vpop.permute.xlu0 %39 }
  0x84   :  { %v50_v21 = vpop.permute.xlu1 %49 }
  0x87   :  { %v45_v22 = vpop.permute.xlu0 %44 }
  0x88   :  { %v55_v23 = vpop.permute.xlu1 %54 }
  0x8b   :  { %v60_v33 = vpop.permute.xlu0 %59 }
  0x8c   :  { %v65_v31 = vpop.permute.xlu1 %64 }
  0x8f   :  { %v70_v41 = vpop.permute.xlu0 %69 }
  0x90   :  { %v75_v38 = vpop.permute.xlu1 %74 }
  0x94   :  { %v229_v2 = vpop.permute.xlu0 %228 }
  0x95   :  { %v233_v3 = vpop.permute.xlu1 %232 }
  0x98   :  { %v241_v4 = vpop.permute.xlu0 %240 }
  0x99   :  { %v237_v7 = vpop.permute.xlu1 %236 }
  0x9c   :  { %v249_v14 = vpop.permute.xlu0 %248 }
  0x9d   :  { %v245_v16 = vpop.permute.xlu1 %244 }
  0xd7   :  { %v537_v24 = vpop.f32.mrb[0].mxu0 }
  0xd8   :  { %v178_v25 = vadd.f32 %v537_v24, %v45_v22  ;;  %v172_v26 = vpop.f32.mrb[1].mxu0 }
  0xd9   :  { %v173_v27 = vadd.f32 %v172_v26, %v40_v20  ;;  %v257_v20 = vpop.permute.xlu0 %256 }
  0xda   :  { %634 = vtanh.f32 %v178_v25 }
  0xdb   :  { %636 = vtanh.f32 %v173_v27  ;;  %v540_v28 = vpop.f32.mrb[2].mxu0 }
  0xdc   :  { %v188_v29 = vadd.f32 %v540_v28, %v55_v23  ;;  %v182_v30 = vpop.f32.mrb[3].mxu0  ;;  %v253_v23 = vpop.permute.xlu1 %252 }
  0xdd   :  { %v183_v32 = vadd.f32 %v182_v30, %v50_v21 }
  0xde   :  { %638 = vtanh.f32 %v188_v29 }
  0xdf   :  { %640 = vtanh.f32 %v183_v32  ;;  %v543_v34 = vpop.f32.mrb[4].mxu0 }
  0xe0   :  { %v198_v35 = vadd.f32 %v543_v34, %v65_v31  ;;  %v192_v36 = vpop.f32.mrb[5].mxu0 }
  0xe1   :  { %v193_v37 = vadd.f32 %v192_v36, %v60_v33 }
  0xe2   :  { %642 = vtanh.f32 %v198_v35 }
  0xe3   :  { %644 = vtanh.f32 %v193_v37  ;;  %v546_v39 = vpop.f32.mrb[6].mxu0 }
  0xe4   :  { %v635_v40 = vpop.eup %634  ;;  %v208_v42 = vadd.f32 %v546_v39, %v75_v38  ;;  %v202_v43 = vpop.f32.mrb[7].mxu0  ;;  %v397_v38 = vld [vmem:[%s809_s3] sm:$0x3] }
  0xe5   :  { %v637_v44 = vpop.eup %636  ;;  %v203_v45 = vadd.f32 %v202_v43, %v70_v41  ;;  %v400_v39 = vpop.permute.xlu1 %399 }
  0xe6   :  { %646 = vtanh.f32 %v208_v42  ;;  %v594_v46 = vpack.c.bf16 %v635_v40, %v637_v44 }
  0xe7   :  { %648 = vtanh.f32 %v203_v45 }
  0xe8   :  { %v639_v47 = vpop.eup %638  ;;  %595 = vmatprep.subr.bf16.mxu1 %v594_v46 }
  0xe9   :  { %v641_v48 = vpop.eup %640  ;;  %597 = vmatpush3.bf16.msra.mxu1 %v594_v46 }
  0xea   :  { %v598_v49 = vpack.c.bf16 %v639_v47, %v641_v48 }
  0xec   :  { %v643_v50 = vpop.eup %642  ;;  %599 = vmatprep.subr.bf16.mxu1 %v598_v49 }
  0xed   :  { %v645_v51 = vpop.eup %644  ;;  %601 = vmatpush3.bf16.msra.mxu1 %v598_v49 }
  0xee   :  { %v602_v52 = vpack.c.bf16 %v643_v50, %v645_v51 }
  0xf0   :  { %v647_v53 = vpop.eup %646  ;;  %603 = vmatprep.subr.bf16.mxu1 %v602_v52 }
  0xf1   :  { %v649_v54 = vpop.eup %648  ;;  %605 = vmatpush3.bf16.msra.mxu1 %v602_v52 }
  0xf2   :  { %v606_v55 = vpack.c.bf16 %v647_v53, %v649_v54 }
  0xf4   :  { %607 = vmatprep.subr.bf16.mxu1 %v606_v55 }
  0xf5   :  { %609 = vmatpush3.bf16.msra.mxu1 %v606_v55 }
  0xf8   :  { %564 = vmatmul.mubr.msk.f32.vlgmr.msra.gmra.mrb[0].mxu1 %vm259_vm2, %v220_v56 }
  0xf9   :  { %566 = vmatprep.mubr.msk.f32.mxu1 %vm259_vm2, %v221_v57 }
  0xfc   :  { %567 = vmatmul.mubr.msk.f32.gmra.mrb[2].mxu1 %vm259_vm2, %v222_v58 }
  0xfd   :  { %569 = vmatprep.mubr.msk.f32.mxu1 %vm259_vm2, %v223_v59 }
 0x100   :  { %570 = vmatmul.mubr.msk.f32.gmra.mrb[4].mxu1 %vm259_vm2, %v224_v60 }
 0x101   :  { %572 = vmatprep.mubr.msk.f32.mxu1 %vm259_vm2, %v225_v61 }
 0x104   :  { %573 = vmatmul.mubr.msk.f32.gmra.mrb[6].mxu1 %vm259_vm2, %v226_v62 }
 0x1cb   :  { %v565_v6 = vpop.f32.mrb[0].mxu1 }
 0x1cc   :  { %v356_v8 = vadd.f32 %v565_v6, %v233_v3  ;;  %v350_v9 = vpop.f32.mrb[1].mxu1 }
 0x1cd   :  { %v351_v10 = vadd.f32 %v350_v9, %v229_v2 }
 0x1ce   :  { %650 = vtanh.f32 %v356_v8 }
 0x1cf   :  { %652 = vtanh.f32 %v351_v10  ;;  %v568_v11 = vpop.f32.mrb[2].mxu1 }
 0x1d0   :  { %v366_v12 = vadd.f32 %v568_v11, %v241_v4  ;;  %v360_v13 = vpop.f32.mrb[3].mxu1 }
 0x1d1   :  { %v361_v15 = vadd.f32 %v360_v13, %v237_v7 }
 0x1d2   :  { %654 = vtanh.f32 %v366_v12 }
 0x1d3   :  { %656 = vtanh.f32 %v361_v15  ;;  %v571_v17 = vpop.f32.mrb[4].mxu1 }
 0x1d4   :  { %v376_v5 = vadd.f32 %v571_v17, %v249_v14  ;;  %v370_v18 = vpop.f32.mrb[5].mxu1 }
 0x1d5   :  { %v371_v19 = vadd.f32 %v370_v18, %v245_v16 }
 0x1d6   :  { %658 = vtanh.f32 %v376_v5 }
 0x1d7   :  { %660 = vtanh.f32 %v371_v19  ;;  %v574_v21 = vpop.f32.mrb[6].mxu1 }
 0x1d8   :  { %v651_v22 = vpop.eup %650  ;;  %v386_v24 = vadd.f32 %v574_v21, %v257_v20  ;;  %v380_v25 = vpop.f32.mrb[7].mxu1 }
 0x1d9   :  { %v653_v26 = vpop.eup %652  ;;  %v381_v27 = vadd.f32 %v380_v25, %v253_v23 }
 0x1da   :  { %662 = vtanh.f32 %v386_v24  ;;  %v611_v28 = vpack.c.bf16 %v651_v22, %v653_v26 }
 0x1db   :  { %664 = vtanh.f32 %v381_v27 }
 0x1dc   :  { %v655_v29 = vpop.eup %654  ;;  %612 = vmatpush3.bf16.msra.mxu0 %v611_v28 }
 0x1dd   :  { %v657_v30 = vpop.eup %656  ;;  %613 = vmatprep.subr.bf16.mxu0 %v668_v63 }
 0x1de   :  { %v614_v31 = vpack.c.bf16 %v655_v29, %v657_v30 }
 0x1e0   :  { %v659_v32 = vpop.eup %658  ;;  %615 = vmatpush3.bf16.msra.mxu0 %v614_v31 }
 0x1e1   :  { %v661_v33 = vpop.eup %660  ;;  %616 = vmatprep.subr.bf16.mxu0 %v668_v63 }
 0x1e2   :  { %v617_v34 = vpack.c.bf16 %v659_v32, %v661_v33 }
 0x1e4   :  { %v663_v35 = vpop.eup %662  ;;  %618 = vmatpush3.bf16.msra.mxu0 %v617_v34 }
 0x1e5   :  { %v665_v36 = vpop.eup %664  ;;  %619 = vmatprep.subr.bf16.mxu0 %v668_v63 }
 0x1e6   :  { %v620_v37 = vpack.c.bf16 %v663_v35, %v665_v36 }
 0x1e8   :  { %621 = vmatpush3.bf16.msra.mxu0 %v620_v37 }
 0x1eb   :  { %592 = vmatmul.mubr.msk.f32.vlgmr.msra.gmra.mrb[8].mxu0 %vm259_vm2, %v397_v38 }
 0x2be   :  { %v471_v40 = vpop.f32.mrb[8].mxu0 }
 0x2bf   :  { %v472_v41 = vadd.f32 %v471_v40, %v400_v39  ;;  %v593_v42 = vpop.f32.mrb[9].mxu0 }
 0x2c1   :  { %476 = vst.msk [vmem:[%s810_s5] sm:$0x3] %vm475_vm4, %v472_v41 }

</bundles_post_ra>
